<compile_context>
chip_gen: v6e
topology: v6e:2x2x1
jax: 0.10.0
libtpu: 0.0.40
codegen_flags: <defaults>
</compile_context>

<pallas_src>
import functools

import jax
import jax.numpy as jnp
from jax.experimental import pallas as pl
from jax.experimental.pallas import tpu as pltpu

_NEG_INIT = -3.0e38  # finite stand-in for -inf (f32 max ~ 3.4e38)


def _lse_kernel(x_ref, o_ref, m_acc, s_acc, *, inv_tau, n_rows, tile_rows,
                needs_mask):
    # x_ref : [TR, 128] prediction tile (input dtype) in VMEM
    # o_ref : [1]       f32 SMEM output: logsumexp over all valid elements
    # m_acc : [8, 128]  f32 VMEM running per-(sublane, lane) max
    # s_acc : [8, 128]  f32 VMEM running per-(sublane, lane) rescaled exp-sum
    tr, lanes = x_ref.shape
    x = x_ref[...].astype(jnp.float32)        # cast per-tile (no f32 HBM copy)
    if inv_tau != 1.0:                        # tau == 1 fast path: no multiply
        x = x * inv_tau

    if tr % 8 != 0:
        # Single full-array block (grid == 1, tiny problem): plain reduction.
        m = jnp.max(x)
        o_ref[0] = m + jnp.log(jnp.sum(jnp.exp(x - m)))
        return

    i = pl.program_id(0)
    last = pl.num_programs(0) - 1

    @pl.when(i == 0)
    def _init():
        m_acc[...] = jnp.full_like(m_acc, _NEG_INIT)
        s_acc[...] = jnp.zeros_like(s_acc)

    def update(xv):
        # Per-(sublane, lane) online logsumexp: pure VPU/EUP, no cross-lane.
        x3 = xv.reshape(tr // 8, 8, lanes)            # tile-aligned re-view
        m_old = m_acc[...]
        m_new = jnp.maximum(m_old, jnp.max(x3, axis=0))
        alpha = jnp.exp(m_old - m_new)
        p = jnp.exp(x3 - m_new[None, :, :])
        s_acc[...] = s_acc[...] * alpha + jnp.sum(p, axis=0)
        m_acc[...] = m_new

    if needs_mask:
        # Only the ragged LAST block pays for the row mask.
        @pl.when(i != last)
        def _fast():
            update(x)

        @pl.when(i == last)
        def _masked():
            rows = (jax.lax.broadcasted_iota(jnp.int32, (tr, lanes), 0)
                    + i * tile_rows)
            update(jnp.where(rows < n_rows, x, _NEG_INIT))
    else:
        update(x)

    @pl.when(i == last)
    def _finalize():
        # One cross-lane/sublane (XLU) reduce for the whole kernel.
        m_fin = jnp.max(m_acc[...])
        s_fin = jnp.sum(s_acc[...] * jnp.exp(m_acc[...] - m_fin))
        o_ref[0] = m_fin + jnp.log(s_fin)


def _global_logsumexp(x2d, *, inv_tau, tile_rows, needs_mask):
    r, lanes = x2d.shape
    kernel = functools.partial(_lse_kernel, inv_tau=inv_tau, n_rows=r,
                               tile_rows=tile_rows, needs_mask=needs_mask)
    out = pl.pallas_call(
        kernel,
        out_shape=jax.ShapeDtypeStruct((1,), jnp.float32),
        grid_spec=pltpu.PrefetchScalarGridSpec(
            num_scalar_prefetch=0,
            grid=(pl.cdiv(r, tile_rows),),
            in_specs=[pl.BlockSpec((tile_rows, lanes), lambda i: (i, 0))],
            out_specs=pl.BlockSpec(memory_space=pltpu.MemorySpace.SMEM),
            scratch_shapes=[
                pltpu.VMEM((8, 128), jnp.float32),   # running per-lane max
                pltpu.VMEM((8, 128), jnp.float32),   # running per-lane exp-sum
            ],
        ),
        compiler_params=pltpu.CompilerParams(
            dimension_semantics=("arbitrary",),      # carried reduction
            vmem_limit_bytes=48 * 1024 * 1024,       # safe on v7x (64 MiB VMEM)
        ),
    )(x2d)
    return out[0]


def cross_entropy_loss(prediction, label, num_classes, weights=None, tau=1.0,
                       tile_rows=None):
    """prediction: [N, C] float, label: [N] int -> scalar f32 loss."""
    assert prediction.ndim == 2 and prediction.shape[-1] == num_classes
    assert weights is None  # TODO(synk): per-element weights not supported.
    n, c = prediction.shape
    inv_tau = float(1.0 / tau)

    # Label term: sum_i x[i, label_i] / tau  (gather over N elements, wrapper).
    picked = jnp.take_along_axis(
        prediction, label.astype(jnp.int32)[:, None], axis=1)
    t = jnp.sum(picked.astype(jnp.float32)) * inv_tau

    # Global logsumexp over every element, streamed as a lane-dense [R, 128]
    # slab (free contiguous reshape; no wrapper-side pad of the big tensor).
    total = n * c
    flat = prediction.reshape(-1)
    n_rows = total // 128
    n_tail = total - n_rows * 128

    itemsize = jnp.dtype(prediction.dtype).itemsize
    sub = max(8, 32 // itemsize)          # sublane packing: f32 8, bf16 16, i8 32
    if tile_rows is None:
        # ~1M elements / tile: 4 MiB f32 (2 MiB bf16) input, f32 temporaries
        # bounded at ~4 MiB each -> near HBM roofline, fits every generation.
        tile_rows = 8192
    tr = max(sub, (int(tile_rows) // sub) * sub)

    lse = None
    if n_rows > 0:
        head = flat[:n_rows * 128] if n_tail else flat
        x2d = head.reshape(n_rows, 128)
        if n_rows <= tr:
            tr_eff, needs_mask = n_rows, False            # single full block
        else:
            tr_eff, needs_mask = tr, (n_rows % tr != 0)   # ragged last block
        lse = _global_logsumexp(x2d, inv_tau=inv_tau, tile_rows=tr_eff,
                                needs_mask=needs_mask)
    if n_tail:
        # < 128 leftover elements: fold in wrapper-side, merge stably.
        tail = flat[n_rows * 128:].astype(jnp.float32) * inv_tau
        m = jnp.max(tail)
        lse_tail = m + jnp.log(jnp.sum(jnp.exp(tail - m)))
        lse = lse_tail if lse is None else jnp.logaddexp(lse, lse_tail)

    # loss = N * log(sum exp(x/tau)) - sum_i x[i, label_i]/tau
    return jnp.float32(n) * lse - t


def _reference(prediction, label, num_classes, tau=1.0):
    x = prediction.astype(jnp.float32) / tau
    p = jnp.exp(x) / jnp.sum(jnp.exp(x))
    one_hot = jax.nn.one_hot(label, num_classes, dtype=jnp.float32)
    return jnp.sum(-one_hot * jnp.log(p))


if __name__ == "__main__":
    key = jax.random.PRNGKey(0)
    ks = jax.random.split(key, 8)

    # Case 1: toy module shape (C=32 < 128): single full-array lane-dense block.
    pred = jax.random.normal(ks[0], (8, 32), dtype=jnp.float32)
    lab = jax.random.randint(ks[1], (8,), 0, 32, dtype=jnp.int32)
    out = jax.block_until_ready(cross_entropy_loss(pred, lab, 32))
    ref = _reference(pred, lab, 32)
    assert jnp.allclose(out, ref, rtol=1e-5, atol=1e-5), (out, ref)

    # Case 2: multi-tile online path + ragged last block (mask) + tau != 1.
    pred2 = jax.random.normal(ks[2], (33, 128), dtype=jnp.float32)
    lab2 = jax.random.randint(ks[3], (33,), 0, 128, dtype=jnp.int32)
    out2 = jax.block_until_ready(
        cross_entropy_loss(pred2, lab2, 128, tau=2.0, tile_rows=8))
    ref2 = _reference(pred2, lab2, 128, tau=2.0)
    assert jnp.allclose(out2, ref2, rtol=1e-5, atol=1e-4), (out2, ref2)

    # Case 3: bf16 input with 16-row sublane tiles + ragged last block.
    pred3 = jax.random.normal(ks[4], (33, 128), dtype=jnp.bfloat16)
    lab3 = jax.random.randint(ks[5], (33,), 0, 128, dtype=jnp.int32)
    out3 = jax.block_until_ready(
        cross_entropy_loss(pred3, lab3, 128, tile_rows=16))
    ref3 = _reference(pred3, lab3, 128)
    assert jnp.allclose(out3, ref3, rtol=1e-4, atol=1e-3), (out3, ref3)

    # Case 4: element count not a multiple of 128 (wrapper-side tail merge).
    pred4 = jax.random.normal(ks[6], (10, 50), dtype=jnp.float32)
    lab4 = jax.random.randint(ks[7], (10,), 0, 50, dtype=jnp.int32)
    out4 = jax.block_until_ready(cross_entropy_loss(pred4, lab4, 50))
    ref4 = _reference(pred4, lab4, 50)
    assert jnp.allclose(out4, ref4, rtol=1e-5, atol=1e-4), (out4, ref4)

    print("KERNEL_OK")
</pallas_src>

<mosaic_0001>
module attributes {stable_mosaic.version = 11 : i64} {
  func.func @_lse_kernel(%arg0: i32, %arg1: memref<2x128xf32, #tpu.memory_space<vmem>>, %arg2: memref<1xf32, #tpu.memory_space<smem>>, %arg3: memref<8x128xf32, #tpu.memory_space<vmem>>, %arg4: memref<8x128xf32, #tpu.memory_space<vmem>>) attributes {dimension_semantics = [#tpu.dimension_semantics<arbitrary>], iteration_bounds = array<i64: 1>, scalar_prefetch = 0 : i64, scratch_operands = 2 : i64, tpu.core_type = #tpu.core_type<tc>, window_params = [{transform_indices = @transform_0, window_bounds = array<i64: 2, 128>}, {transform_indices = @transform_1, window_bounds = array<i64: 1>}]} {
    %c0 = arith.constant 0 : index
    %c0_0 = arith.constant 0 : index
    %0 = vector.load %arg1[%c0, %c0_0] : memref<2x128xf32, #tpu.memory_space<vmem>>, vector<2x128xf32>
    %1 = vector.shape_cast %0 : vector<2x128xf32> to vector<1x2x128xf32>
    %cst = arith.constant dense<0xFF800000> : vector<1xf32>
    %2 = vector.multi_reduction <maximumf>, %1, %cst [1, 2] : vector<1x2x128xf32> to vector<1xf32>
    %3 = vector.shape_cast %2 : vector<1xf32> to vector<1x1x1xf32>
    %4 = vector.extract %3[0, 0, 0] : f32 from vector<1x1x1xf32>
    %5 = vector.broadcast %4 : f32 to vector<2x128xf32>
    %6 = arith.subf %0, %5 : vector<2x128xf32>
    %7 = math.exp %6 : vector<2x128xf32>
    %8 = vector.shape_cast %7 : vector<2x128xf32> to vector<1x2x128xf32>
    %cst_1 = arith.constant dense<0.000000e+00> : vector<1xf32>
    %9 = vector.multi_reduction <add>, %8, %cst_1 [1, 2] : vector<1x2x128xf32> to vector<1xf32>
    %10 = vector.shape_cast %9 : vector<1xf32> to vector<1x1x1xf32>
    %11 = vector.extract %10[0, 0, 0] : f32 from vector<1x1x1xf32>
    %12 = math.log %11 : f32
    %13 = arith.addf %4, %12 : f32
    %c0_2 = arith.constant 0 : index
    %14 = memref.load %arg2[%c0_2] : memref<1xf32, #tpu.memory_space<smem>>
    memref.store %13, %arg2[%c0_2] : memref<1xf32, #tpu.memory_space<smem>>
    return
  }
  func.func @transform_0(%arg0: i32) -> (i32, i32) {
    %c0_i32 = arith.constant 0 : i32
    %c0_i32_0 = arith.constant 0 : i32
    return %arg0, %c0_i32 : i32, i32
  }
  func.func @transform_1(%arg0: i32) -> i32 {
    %c0_i32 = arith.constant 0 : i32
    %c0_i32_0 = arith.constant 0 : i32
    return %c0_i32 : i32
  }
}

</mosaic_0001>

<bundles_post_ra>
// kernel: tpu_custom_call.1
= control target key start
LH: loop header
LB: loop body
LE: loop exit
PB: predicated region body
PF: predicated region fallthrough
CT: control target
= control target key end

     0   :  { %6 = vsyncpa [#allocation5], 0  ;;  %s132_s0 = inlined_call_operand.hbm [shape: f32[2,128], index: 0, kind: input, shape index: {}]   ;;  %s133_s1 = inlined_call_operand.hbm [shape: f32[1], index: 1, kind: output, shape index: {}]  }
   0x1   :  { %7 = vsyncpa [#allocation6], 0  ;;  %s112_s6 = smov [#allocation4]  }
   0x2   :  { %s14_s7 = sshll.u32 %s112_s6, 4  ;;  %s15_s7 = int_to_ptr.vmem [resolvable:$true] %s14_s7 }
   0x3   :  { %s88_s8 = scalar_lea.vmem %s15_s7, 32  ;;  %p93_p1 = scmp.lt.s32.totalorder %s15_s7, %s15_s7 }
   0x4   :  { %p89_p0 = scmp.ne.s32.totalorder %s15_s7, %s88_s8  ;;  %p94_p2 = scmp.lt.s32.totalorder %s88_s8, %s88_s8 }
   0x6   :  { %p95_p3 = por %p94_p2, %p93_p1 }
   0x8   :  { %p96_p4 = pnand %p95_p3, %p89_p0 }
   0xa   :  { %99 = shalt.err (!%p96_p4)
}
   0xb   :  { %17 = dma.hbm_to_vmem [thread:$0]  %s132_s0, 32, %s15_s7, [#allocation5]  }
   0xc   :  { %108 = dma.done.wait [#allocation5], 32  }
   0xd   :  { %109 = vsyncadd [#allocation5], 4294967264  ;;  %vm22_vm0 = vcmask 1041408   ;;  %v21_v0 = vld [vmem:[#allocation4] sm:$0x3]  ;;  %s113_s14 = smov [#allocation7]  }
   0xe   :  { %v23_v1 = vsel %vm22_vm0, %v21_v0, -inf }
   0xf   :  { %24 = vmax.xlane.f32.xlu0 %v23_v1 }
  0x98   :  { %v25_v2 = vpop.xlane.xlu0 %24 }
  0x99   :  { %v26_v3 = vrot.slane %v25_v2, 4 }
  0x9b   :  { %v27_v4 = vmax.f32 %v25_v2, %v26_v3 }
  0x9d   :  { %v28_v5 = vrot.slane %v27_v4, 2 }
  0x9f   :  { %v29_v6 = vmax.f32 %v27_v4, %v28_v5 }
  0xa1   :  { %v30_v7 = vrot.slane %v29_v6, 1 }
  0xa3   :  { %v31_v8 = vmax.f32 %v29_v6, %v30_v7 }
  0xa5   :  { %68 = vpush %v31_v8 }
  0xd6   :  { %s69_s11 = spop %68 }
  0xd7   :  { %v33_v9 = vstv %s69_s11 }
  0xd8   :  { %v34_v10 = vsub.f32 %v21_v0, %v33_v9 }
  0xda   :  { %v35_v11 = vmul.f32 1.442695, %v34_v10 }
  0xdc   :  { %76 = vpow2.f32 %v35_v11 }
  0xe9   :  { %v77_v12 = vpop.eup %76 }
  0xea   :  { %v37_v13 = vsel %vm22_vm0, %v77_v12, 0.0 }
  0xeb   :  { %38 = vadd.xlane.f32.xlu0 %v37_v13 }
 0x174   :  { %v39_v14 = vpop.xlane.xlu0 %38 }
 0x175   :  { %v40_v15 = vrot.slane %v39_v14, 4 }
 0x177   :  { %v41_v16 = vadd.f32 %v40_v15, %v39_v14 }
 0x179   :  { %v42_v17 = vrot.slane %v41_v16, 2 }
 0x17b   :  { %v43_v18 = vadd.f32 %v42_v17, %v41_v16 }
 0x17d   :  { %v44_v19 = vrot.slane %v43_v18, 1 }
 0x17f   :  { %v45_v20 = vadd.f32 %v44_v19, %v43_v18 }
 0x181   :  { %70 = vpush %v45_v20 }
 0x1b2   :  { %s71_s0 = spop %70 }
 0x1b3   :  { %v47_v21 = vstv %s71_s0 }
 0x1b4   :  { %78 = vlog2.f32 %v47_v21 }
 0x1c1   :  { %v79_v22 = vpop.eup %78 }
 0x1c2   :  { %v49_v23 = vmul.f32 0.6931472, %v79_v22 }
 0x1c4   :  { %72 = vpush %v49_v23 }
 0x1f5   :  { %s73_s12 = spop %72 }
 0x1f6   :  { %s51_s13 = sadd.f32 %s73_s12, %s69_s11 }
 0x1f8   :  { %53 = sst [smem:[#allocation7]] %s51_s13 }
 0x1f9   :  { %61 = dma.smem_to_hbm %s113_s14, 16, %s133_s1, [#allocation6]  }
 0x1fa   :  { %110 = dma.done.wait [#allocation6], 16  }
 0x1fb   :  { %111 = vsyncadd [#allocation6], 4294967280 }
 0x1fc   :  { %65 = sfence }
 0x1fd   :  { %66 = vsyncpa [#allocation5], 1 }
 0x1fe   :  { %67 = vsyncpa [#allocation6], 1 }

</bundles_post_ra>
